<compile_context>
chip_gen: v7x
topology: tpu7x:2x2x1
jax: 0.10.0
libtpu: 0.0.40
codegen_flags: <defaults>
</compile_context>

<pallas_src>
import math
import functools

import jax
import jax.numpy as jnp
from jax import lax
from jax.experimental import pallas as pl
from jax.experimental.pallas import tpu as pltpu


def _pick_tile(n, target):
    """Largest tile <= target that divides n and is a multiple of 8 (else n)."""
    if n <= target:
        return n
    for t in range(target - target % 8, 7, -8):
        if n % t == 0:
            return t
    return n


# ----------------------------------------------------------------------------
# Fused linear kernel: y = x @ W_cat^T + b_cat, split column-wise into outputs
# ----------------------------------------------------------------------------
def _fused_linear_kernel(x_ref, w_ref, b_ref, *out_refs, d_outs):
    # Contract on Din with W kept as (Dout, Din): no weight transpose anywhere.
    y = lax.dot_general(
        x_ref[...], w_ref[...],
        dimension_numbers=(((1,), (1,)), ((), ())),
        preferred_element_type=jnp.float32) + b_ref[...]
    off = 0
    for o_ref, d in zip(out_refs, d_outs):
        o_ref[...] = y[:, off:off + d].astype(o_ref.dtype)
        off += d


def fused_linear(x2d, weights, biases, *, tile_m=512):
    """x2d: (M, Din); weights[i]: (Dout_i, Din); returns list of (M, Dout_i)."""
    M, Din = x2d.shape
    d_outs = tuple(int(w.shape[0]) for w in weights)
    total = sum(d_outs)
    w_cat = weights[0] if len(weights) == 1 else jnp.concatenate(weights, axis=0)
    b_cat = biases[0] if len(biases) == 1 else jnp.concatenate(biases, axis=0)
    tm = _pick_tile(M, tile_m)
    kernel = functools.partial(_fused_linear_kernel, d_outs=d_outs)
    outs = pl.pallas_call(
        kernel,
        out_shape=tuple(jax.ShapeDtypeStruct((M, d), x2d.dtype) for d in d_outs),
        grid=(M // tm,),
        in_specs=[
            pl.BlockSpec((tm, Din), lambda i: (i, 0)),
            pl.BlockSpec((total, Din), lambda i: (0, 0)),   # weights stay resident
            pl.BlockSpec((1, total), lambda i: (0, 0)),
        ],
        out_specs=tuple(pl.BlockSpec((tm, d), lambda i: (i, 0)) for d in d_outs),
        compiler_params=pltpu.CompilerParams(dimension_semantics=("parallel",)),
    )(x2d, w_cat, b_cat.reshape(1, total))
    if not isinstance(outs, (list, tuple)):
        outs = (outs,)
    return list(outs)


# ----------------------------------------------------------------------------
# Attention kernel: one grid step per (batch, q-tile), all heads batched inside
# ----------------------------------------------------------------------------
def _attn_kernel(qlen_ref, klen_ref, q_ref, k_ref, v_ref, o_ref, *,
                 scale, causal, num_heads):
    b = pl.program_id(0)
    qlen = qlen_ref[b]                                # scalar-path reads, once
    klen = klen_ref[b]

    q = q_ref[...].astype(jnp.float32) * scale        # pre-scale Q (tq, D)
    k = k_ref[...].astype(jnp.float32)                # (Sk, D)
    v = v_ref[...].astype(jnp.float32)                # (Sk, D)
    tq, D = q.shape
    Sk = k.shape[0]
    dk = D // num_heads
    q_off = pl.program_id(1) * tq

    # Masks built once from 1-D index vectors, shared by every head.
    q_idx = lax.broadcasted_iota(jnp.int32, (tq, 1), 0) + q_off
    k_idx = lax.broadcasted_iota(jnp.int32, (1, Sk), 1)
    valid = (q_idx < qlen) & (k_idx < klen)            # (tq, Sk)
    if causal:
        valid = valid & (k_idx <= q_idx)

    outs = []
    for h in range(num_heads):                         # static, unrolled
        cols = slice(h * dk, (h + 1) * dk)
        # scores: contract on dk directly (no K^T materialization)
        s = lax.dot_general(q[:, cols], k[:, cols],
                            dimension_numbers=(((1,), (1,)), ((), ())),
                            preferred_element_type=jnp.float32)   # (tq, Sk)
        s = jnp.where(valid, s, -jnp.inf)
        # softmax with torch softmax(...).nan_to_num() semantics:
        # fully-masked rows yield all-zero probabilities.
        m = jnp.max(s, axis=-1, keepdims=True)
        m_safe = jnp.where(jnp.isfinite(m), m, 0.0)
        e = jnp.exp(s - m_safe)
        den = jnp.sum(e, axis=-1, keepdims=True)
        den_safe = jnp.where(den > 0.0, den, 1.0)
        p = jnp.where(den > 0.0, e / den_safe, 0.0)
        outs.append(jnp.dot(p, v[:, cols], preferred_element_type=jnp.float32))

    # Head-merged, lane-dense (tq, D) store.
    o_ref[...] = jnp.concatenate(outs, axis=-1).astype(o_ref.dtype)


def attention_pallas(q, k, v, q_len, k_len, *, num_heads, causal, tile_q=256):
    """q: (B, Sq, D), k/v: (B, Sk, D), q_len/k_len: (B,) -> (B, Sq, D) merged."""
    B, Sq, D = q.shape
    Sk = k.shape[1]
    dk = D // num_heads
    tq = _pick_tile(Sq, tile_q)
    kernel = functools.partial(_attn_kernel, scale=1.0 / math.sqrt(dk),
                               causal=causal, num_heads=num_heads)
    grid_spec = pltpu.PrefetchScalarGridSpec(
        num_scalar_prefetch=2,
        grid=(B, Sq // tq),
        in_specs=[
            pl.BlockSpec((None, tq, D), lambda b, i, ql, kl: (b, i, 0)),
            pl.BlockSpec((None, Sk, D), lambda b, i, ql, kl: (b, 0, 0)),
            pl.BlockSpec((None, Sk, D), lambda b, i, ql, kl: (b, 0, 0)),
        ],
        out_specs=pl.BlockSpec((None, tq, D), lambda b, i, ql, kl: (b, i, 0)),
    )
    # TODO(synk): for long Sk, replace the full-Sk K/V blocks with a
    # flash-style online-softmax loop over Sk tiles to bound VMEM (v7x).
    return pl.pallas_call(
        kernel,
        out_shape=jax.ShapeDtypeStruct((B, Sq, D), q.dtype),
        grid_spec=grid_spec,
        compiler_params=pltpu.CompilerParams(
            dimension_semantics=("parallel", "parallel")),
    )(q_len.astype(jnp.int32), k_len.astype(jnp.int32), q, k, v)


# ----------------------------------------------------------------------------
# Full MultiHeadAttention forward
# ----------------------------------------------------------------------------
def multi_head_attention(in_q, in_k, in_v, q_pad_mask, k_pad_mask, params,
                         num_heads, enable_causal_mask=False):
    B, Sq, D = in_q.shape
    Sk = in_k.shape[1]

    q2d = in_q.reshape(B * Sq, D)
    k2d = in_k.reshape(B * Sk, D)
    v2d = in_v.reshape(B * Sk, D)

    wq, bq = params["wq"], params["bq"]
    wk, bk = params["wk"], params["bk"]
    wv, bv = params["wv"], params["bv"]

    # Fuse projections that share the same input (self-attention => one call).
    if (in_q is in_k) and (in_k is in_v):
        Q2, K2, V2 = fused_linear(q2d, [wq, wk, wv], [bq, bk, bv])
    elif in_k is in_v:
        (Q2,) = fused_linear(q2d, [wq], [bq])
        K2, V2 = fused_linear(k2d, [wk, wv], [bk, bv])
    else:
        (Q2,) = fused_linear(q2d, [wq], [bq])
        (K2,) = fused_linear(k2d, [wk], [bk])
        (V2,) = fused_linear(v2d, [wv], [bv])

    Q = Q2.reshape(B, Sq, D)
    K = K2.reshape(B, Sk, D)
    V = V2.reshape(B, Sk, D)

    q_len = q_pad_mask.astype(jnp.int32).sum(axis=1)
    k_len = k_pad_mask.astype(jnp.int32).sum(axis=1)

    # Heads split / merged inside the kernel; output is already (B, Sq, D).
    attn = attention_pallas(Q, K, V, q_len, k_len,
                            num_heads=num_heads, causal=enable_causal_mask)

    (out2,) = fused_linear(attn.reshape(B * Sq, D), [params["wo"]], [params["bo"]])
    return out2.reshape(B, Sq, D)


# ----------------------------------------------------------------------------
# Pure-JAX reference (mirrors the PyTorch forward exactly)
# ----------------------------------------------------------------------------
def mha_reference(in_q, in_k, in_v, q_pad_mask, k_pad_mask, params,
                  num_heads, enable_causal_mask=False):
    B, Sq, D = in_q.shape
    Sk = in_k.shape[1]
    dk = D // num_heads
    Q = in_q @ params["wq"].T + params["bq"]
    K = in_k @ params["wk"].T + params["bk"]
    V = in_v @ params["wv"].T + params["bv"]
    Qh = Q.reshape(B, Sq, num_heads, dk).transpose(0, 2, 1, 3)
    Kh = K.reshape(B, Sk, num_heads, dk).transpose(0, 2, 1, 3)
    Vh = V.reshape(B, Sk, num_heads, dk).transpose(0, 2, 1, 3)
    scores = jnp.einsum("bhqd,bhkd->bhqk", Qh, Kh) / math.sqrt(dk)
    if enable_causal_mask:
        causal_add = jnp.where(jnp.arange(Sk)[None, :] > jnp.arange(Sq)[:, None],
                               -jnp.inf, 0.0)
        scores = scores + causal_add
    q_len = q_pad_mask.astype(jnp.int32).sum(axis=1)
    k_len = k_pad_mask.astype(jnp.int32).sum(axis=1)
    q_valid = jnp.arange(Sq)[None, :] < q_len[:, None]
    k_valid = jnp.arange(Sk)[None, :] < k_len[:, None]
    valid = (q_valid[:, :, None] & k_valid[:, None, :])[:, None, :, :]
    scores = jnp.where(valid, scores, -jnp.inf)
    m = jnp.max(scores, axis=-1, keepdims=True)
    e = jnp.exp(scores - m)
    p = jnp.nan_to_num(e / jnp.sum(e, axis=-1, keepdims=True))
    attn = jnp.einsum("bhqk,bhkd->bhqd", p, Vh)
    Hcat = attn.transpose(0, 2, 1, 3).reshape(B, Sq, D)
    return Hcat @ params["wo"].T + params["bo"]


# ----------------------------------------------------------------------------
# Main
# ----------------------------------------------------------------------------
if __name__ == "__main__":
    d_model = 32
    num_heads = 4
    B, Sq, Sk = 2, 8, 8

    key = jax.random.PRNGKey(0)
    keys = jax.random.split(key, 16)
    bound = 1.0 / math.sqrt(d_model)

    def init_w(k):
        return jax.random.uniform(k, (d_model, d_model), jnp.float32, -bound, bound)

    def init_b(k):
        return jax.random.uniform(k, (d_model,), jnp.float32, -bound, bound)

    params = {
        "wq": init_w(keys[0]), "bq": init_b(keys[1]),
        "wk": init_w(keys[2]), "bk": init_b(keys[3]),
        "wv": init_w(keys[4]), "bv": init_b(keys[5]),
        "wo": init_w(keys[6]), "bo": init_b(keys[7]),
    }

    # --- Case 1: self-attention (fused QKV path) with causal mask ------------
    x = jax.random.normal(keys[8], (B, Sq, d_model), jnp.float32)
    lens = jnp.array([8, 5], jnp.int32)
    pad = (jnp.arange(Sq)[None, :] < lens[:, None]).astype(jnp.int32)

    out_sa = multi_head_attention(x, x, x, pad, pad, params, num_heads,
                                  enable_causal_mask=True)
    out_sa = jax.block_until_ready(out_sa)
    ref_sa = mha_reference(x, x, x, pad, pad, params, num_heads,
                           enable_causal_mask=True)
    assert out_sa.shape == (B, Sq, d_model)
    assert jnp.allclose(out_sa, ref_sa, atol=1e-4, rtol=1e-4), \
        "self-attention mismatch vs reference"

    # --- Case 2: cross-attention (separate inputs/masks, no causal) ----------
    in_Q = jax.random.normal(keys[9], (B, Sq, d_model), jnp.float32)
    in_K = jax.random.normal(keys[10], (B, Sk, d_model), jnp.float32)
    in_V = jax.random.normal(keys[11], (B, Sk, d_model), jnp.float32)
    q_lens = jnp.array([8, 5], jnp.int32)
    k_lens = jnp.array([6, 8], jnp.int32)
    Q_pad_mask = (jnp.arange(Sq)[None, :] < q_lens[:, None]).astype(jnp.int32)
    K_pad_mask = (jnp.arange(Sk)[None, :] < k_lens[:, None]).astype(jnp.int32)

    out_ca = multi_head_attention(in_Q, in_K, in_V, Q_pad_mask, K_pad_mask,
                                  params, num_heads, enable_causal_mask=False)
    out_ca = jax.block_until_ready(out_ca)
    ref_ca = mha_reference(in_Q, in_K, in_V, Q_pad_mask, K_pad_mask,
                           params, num_heads, enable_causal_mask=False)
    assert out_ca.shape == (B, Sq, d_model)
    assert jnp.allclose(out_ca, ref_ca, atol=1e-4, rtol=1e-4), \
        "cross-attention mismatch vs reference"

    print("KERNEL_OK")
</pallas_src>

<mosaic_0001>
module attributes {stable_mosaic.version = 11 : i64} {
  func.func @_fused_linear_kernel(%arg0: i32, %arg1: memref<16x32xf32, #tpu.memory_space<vmem>>, %arg2: memref<96x32xf32, #tpu.memory_space<vmem>>, %arg3: memref<1x96xf32, #tpu.memory_space<vmem>>, %arg4: memref<16x32xf32, #tpu.memory_space<vmem>>, %arg5: memref<16x32xf32, #tpu.memory_space<vmem>>, %arg6: memref<16x32xf32, #tpu.memory_space<vmem>>) attributes {dimension_semantics = [#tpu.dimension_semantics<parallel>], iteration_bounds = array<i64: 1>, scalar_prefetch = 0 : i64, scratch_operands = 0 : i64, tpu.core_type = #tpu.core_type<tc>, window_params = [{transform_indices = @transform_0, window_bounds = array<i64: 16, 32>}, {pipeline_mode = #tpu.pipeline_mode<synchronous>, transform_indices = @transform_1, window_bounds = array<i64: 96, 32>}, {pipeline_mode = #tpu.pipeline_mode<synchronous>, transform_indices = @transform_2, window_bounds = array<i64: 1, 96>}, {transform_indices = @transform_3, window_bounds = array<i64: 16, 32>}, {transform_indices = @transform_4, window_bounds = array<i64: 16, 32>}, {transform_indices = @transform_5, window_bounds = array<i64: 16, 32>}]} {
    %c0 = arith.constant 0 : index
    %c0_0 = arith.constant 0 : index
    %0 = vector.load %arg1[%c0, %c0_0] : memref<16x32xf32, #tpu.memory_space<vmem>>, vector<16x32xf32>
    %c0_1 = arith.constant 0 : index
    %c0_2 = arith.constant 0 : index
    %1 = vector.load %arg2[%c0_1, %c0_2] : memref<96x32xf32, #tpu.memory_space<vmem>>, vector<96x32xf32>
    %cst = arith.constant dense<0.000000e+00> : vector<16x96xf32>
    %2 = tpu.matmul %0, %1, %cst {dimension_numbers = #tpu.dot_dimension_numbers<[1], [1], [0], [0], [0, 0, 1, 0], [], []>} : vector<16x32xf32>, vector<96x32xf32>, vector<16x96xf32> -> vector<16x96xf32>
    %c0_3 = arith.constant 0 : index
    %c0_4 = arith.constant 0 : index
    %3 = vector.load %arg3[%c0_3, %c0_4] : memref<1x96xf32, #tpu.memory_space<vmem>>, vector<1x96xf32>
    %4 = vector.broadcast %3 : vector<1x96xf32> to vector<16x96xf32>
    %5 = arith.addf %2, %4 : vector<16x96xf32>
    %6 = vector.extract_strided_slice %5 {offsets = [0, 0], sizes = [16, 32], strides = [1, 1]} : vector<16x96xf32> to vector<16x32xf32>
    %c0_5 = arith.constant 0 : index
    %c0_6 = arith.constant 0 : index
    %7 = vector.load %arg4[%c0_5, %c0_6] : memref<16x32xf32, #tpu.memory_space<vmem>>, vector<16x32xf32>
    tpu.vector_store %arg4[%c0_5, %c0_6], %6 {strides = array<i32>} : memref<16x32xf32, #tpu.memory_space<vmem>>, vector<16x32xf32>,
    %8 = vector.extract_strided_slice %5 {offsets = [0, 32], sizes = [16, 32], strides = [1, 1]} : vector<16x96xf32> to vector<16x32xf32>
    %c0_7 = arith.constant 0 : index
    %c0_8 = arith.constant 0 : index
    %9 = vector.load %arg5[%c0_7, %c0_8] : memref<16x32xf32, #tpu.memory_space<vmem>>, vector<16x32xf32>
    tpu.vector_store %arg5[%c0_7, %c0_8], %8 {strides = array<i32>} : memref<16x32xf32, #tpu.memory_space<vmem>>, vector<16x32xf32>,
    %10 = vector.extract_strided_slice %5 {offsets = [0, 64], sizes = [16, 32], strides = [1, 1]} : vector<16x96xf32> to vector<16x32xf32>
    %c0_9 = arith.constant 0 : index
    %c0_10 = arith.constant 0 : index
    %11 = vector.load %arg6[%c0_9, %c0_10] : memref<16x32xf32, #tpu.memory_space<vmem>>, vector<16x32xf32>
    tpu.vector_store %arg6[%c0_9, %c0_10], %10 {strides = array<i32>} : memref<16x32xf32, #tpu.memory_space<vmem>>, vector<16x32xf32>,
    return
  }
  func.func @transform_0(%arg0: i32) -> (i32, i32) {
    %c0_i32 = arith.constant 0 : i32
    %c0_i32_0 = arith.constant 0 : i32
    return %arg0, %c0_i32 : i32, i32
  }
  func.func @transform_1(%arg0: i32) -> (i32, i32) {
    %c0_i32 = arith.constant 0 : i32
    %c0_i32_0 = arith.constant 0 : i32
    %c0_i32_1 = arith.constant 0 : i32
    return %c0_i32, %c0_i32_0 : i32, i32
  }
  func.func @transform_2(%arg0: i32) -> (i32, i32) {
    %c0_i32 = arith.constant 0 : i32
    %c0_i32_0 = arith.constant 0 : i32
    %c0_i32_1 = arith.constant 0 : i32
    return %c0_i32, %c0_i32_0 : i32, i32
  }
  func.func @transform_3(%arg0: i32) -> (i32, i32) {
    %c0_i32 = arith.constant 0 : i32
    %c0_i32_0 = arith.constant 0 : i32
    return %arg0, %c0_i32 : i32, i32
  }
  func.func @transform_4(%arg0: i32) -> (i32, i32) {
    %c0_i32 = arith.constant 0 : i32
    %c0_i32_0 = arith.constant 0 : i32
    return %arg0, %c0_i32 : i32, i32
  }
  func.func @transform_5(%arg0: i32) -> (i32, i32) {
    %c0_i32 = arith.constant 0 : i32
    %c0_i32_0 = arith.constant 0 : i32
    return %arg0, %c0_i32 : i32, i32
  }
}

</mosaic_0001>

<bundles_post_ra>
// kernel: tpu_custom_call.1
= control target key start
LH: loop header
LB: loop body
LE: loop exit
PB: predicated region body
PF: predicated region fallthrough
CT: control target
= control target key end

     0   :  { %11 = vsyncpa [#allocation3], 0  ;;  %vm40_vm0 = vcmask 261120   ;;  %s566_s0 = inlined_call_operand.vmem [shape: f32[16,32], index: 0, kind: input, shape index: {}]   ;;  %s567_s1 = inlined_call_operand.vmem [shape: f32[96,32], index: 1, kind: input, shape index: {}]   ;;  %s568_s2 = inlined_call_operand.vmem [shape: f32[1,96], index: 2, kind: input, shape index: {}]   ;;  %s569_s3 = inlined_call_operand.hbm [shape: f32[16,32], index: 3, kind: output, shape index: {0}]   ;;  %s570_s4 = inlined_call_operand.hbm [shape: f32[16,32], index: 4, kind: output, shape index: {1}]   ;;  %s571_s5 = inlined_call_operand.hbm [shape: f32[16,32], index: 5, kind: output, shape index: {2}]  }
   0x1   :  { %v21_v0 = vld [vmem:[%s567_s1] sm:$0xff]  ;;  %v22_v1 = vld [vmem:[%s567_s1 + $0x8] sm:$0xff]  ;;  %v23_v2 = vld [vmem:[%s567_s1 + $0x10] sm:$0xff] }
   0x2   :  { %v281_v3 = vpack.c.bf16 %v22_v1, %v21_v0  ;;  %vm442_vm1 = vmpackc.low %vm40_vm0, %vm40_vm0  ;;  %v24_v5 = vld [vmem:[%s567_s1 + $0x18] sm:$0xff]  ;;  %v19_v7 = vld [vmem:[%s566_s0] sm:$0xff] }
   0x3   :  { %v287_v6 = vpack.c.bf16 %v24_v5, %v23_v2  ;;  %278 = vmatprep.mubr.msk.f32.mxu0 %vm40_vm0, %v19_v7 }
   0x4   :  { %283 = vmatprep.subr.msk.bf16.mxu0 %vm442_vm1, %v281_v3 }
   0x5   :  { %286 = vmatpush3.bf16.xpose.msk.msra.mxu0 %vm442_vm1, %v281_v3 }
   0x6   :  { %289 = vmatprep.subr.msk.bf16.mxu0 %vm442_vm1, %v287_v6 }
   0x7   :  { %12 = vsyncpa [#allocation5], 0  ;;  %v25_v8 = vld [vmem:[%s567_s1 + $0x20] sm:$0xff]  ;;  %v26_v9 = vld [vmem:[%s567_s1 + $0x28] sm:$0xff]  ;;  %s395_s24 = smov 64  }
   0x8   :  { %v293_v10 = vpack.c.bf16 %v26_v9, %v25_v8  ;;  %v27_v11 = vld [vmem:[%s567_s1 + $0x30] sm:$0xff]  ;;  %v28_v12 = vld [vmem:[%s567_s1 + $0x38] sm:$0xff]  ;;  %v29_v14 = vld [vmem:[%s567_s1 + $0x40] sm:$0xff] }
   0x9   :  { %v299_v13 = vpack.c.bf16 %v28_v12, %v27_v11  ;;  %v30_v15 = vld [vmem:[%s567_s1 + $0x48] sm:$0xff]  ;;  %v31_v17 = vld [vmem:[%s567_s1 + $0x50] sm:$0xff]  ;;  %v32_v18 = vld [vmem:[%s567_s1 + $0x58] sm:$0xff]  ;;  %s394_s1 = smov [#allocation2]  }
   0xa   :  { %v305_v16 = vpack.c.bf16 %v30_v15, %v29_v14  ;;  %v311_v19 = vpack.c.bf16 %v32_v18, %v31_v17  ;;  %v20_v20 = vld [vmem:[%s566_s0 + $0x8] sm:$0xff]  ;;  %v225_v21 = vld [vmem:[%s568_s2] ss:$0 sm:$0xff]  ;;  %s183_s23 = sshll.u32 %s394_s1, 4  ;;  %s396_s0 = smov 96   ;;  %s184_s23 = int_to_ptr.vmem [resolvable:$true] %s183_s23 }
   0xb   :  { %s324_s25 = scalar_lea.vmem %s184_s23, 256  ;;  %p329_p1 = scmp.lt.s32.totalorder %s184_s23, %s184_s23 }
   0xc   :  { %p325_p0 = scmp.ne.s32.totalorder %s184_s23, %s324_s25  ;;  %p330_p2 = scmp.lt.s32.totalorder %s324_s25, %s324_s25 }
   0xd   :  { %292 = vmatpush3.bf16.xpose.msk.msra.mxu0 %vm442_vm1, %v287_v6 }
   0xe   :  { %295 = vmatprep.subr.msk.bf16.mxu0 %vm442_vm1, %v293_v10  ;;  %p331_p3 = por %p330_p2, %p329_p1 }
  0x10   :  { %p332_p4 = pnand %p331_p3, %p325_p0 }
  0x15   :  { %298 = vmatpush3.bf16.xpose.msk.msra.mxu0 %vm442_vm1, %v293_v10 }
  0x16   :  { %301 = vmatprep.subr.msk.bf16.mxu0 %vm442_vm1, %v299_v13 }
  0x1d   :  { %304 = vmatpush3.bf16.xpose.msk.msra.mxu0 %vm442_vm1, %v299_v13 }
  0x1e   :  { %307 = vmatprep.subr.msk.bf16.mxu0 %vm442_vm1, %v305_v16 }
  0x25   :  { %310 = vmatpush3.bf16.xpose.msk.msra.mxu0 %vm442_vm1, %v305_v16 }
  0x26   :  { %313 = vmatprep.subr.msk.bf16.mxu0 %vm442_vm1, %v311_v19 }
  0x2d   :  { %316 = vmatpush3.bf16.xpose.msk.msra.mxu0 %vm442_vm1, %v311_v19 }
  0x34   :  { %279 = vmatmul.mubr.msk.f32.vlgmr.msra.gmra.mrb[0].mxu0 %vm40_vm0, %v20_v20 }
 0x107   :  { %v280_v22 = vpop.f32.mrb[0].mxu0 }
 0x108   :  { %v155_v23 = vadd.f32 %v280_v22, %v225_v21  ;;  %v149_v24 = vpop.f32.mrb[1].mxu0 }
 0x109   :  { %v150_v25 = vadd.f32 %v225_v21, %v149_v24 }
 0x10a   :  { %159 = vst.msk [vmem:[#allocation2 + $0x8] sm:$0xff] %vm40_vm0, %v155_v23 }
 0x10b   :  { %158 = vst.msk [vmem:[#allocation2] sm:$0xff] %vm40_vm0, %v150_v25  ;;  %170 = vrot.lane.b32.xlu1 %v150_v25, %s395_s24  ;;  %162 = vrot.lane.b32.xlu0 %v150_v25, %s396_s0 }
 0x10c   :  { %335 = shalt.err (!%p332_p4)
}
 0x10d   :  { %s336_s27 = scalar_lea.hbm %s569_s3, 256 }
 0x10e   :  { %p337_p5 = scmp.ne.s32.totalorder %s569_s3, %s336_s27  ;;  %p340_p6 = scmp.lt.u32.totalorder %s336_s27, %s569_s3 }
 0x110   :  { %p342_p7 = pnand %p340_p6, %p337_p5 }
 0x112   :  { %345 = shalt.err (!%p342_p7)
}
 0x113   :  { %s397_s7 = smov 128   ;;  %s398_s8 = smov 8   ;;  %172 = vrot.lane.b32.xlu1 %v155_v23, %s395_s24  ;;  %164 = vrot.lane.b32.xlu0 %v155_v23, %s396_s0 }
 0x114   :  { %189 = dma.vmem_to_hbm [thread:$0]  %s184_s23, 256, %s569_s3, [#allocation3], %s397_s7, %s397_s7, %s398_s8  }
 0x115   :  { %s399_s11 = smov [#allocation4]   ;;  %s400_s13 = smov [#allocation6]  }
 0x116   :  { %s195_s12 = sshll.u32 %s399_s11, 4  ;;  %s207_s14 = sshll.u32 %s400_s13, 4  ;;  %s196_s12 = int_to_ptr.vmem [resolvable:$true] %s195_s12  ;;  %s527_s14 = int_to_ptr.vmem [resolvable:$true] %s207_s14 }
 0x117   :  { %s346_s3 = scalar_lea.vmem %s196_s12, 256  ;;  %p351_p9 = scmp.lt.s32.totalorder %s196_s12, %s196_s12 }
 0x118   :  { %p347_p8 = scmp.ne.s32.totalorder %s196_s12, %s346_s3  ;;  %p352_p10 = scmp.lt.s32.totalorder %s346_s3, %s346_s3 }
 0x11a   :  { %p353_p11 = por %p352_p10, %p351_p9 }
 0x11c   :  { %p354_p12 = pnand %p353_p11, %p347_p8 }
 0x17d   :  { %v171_v26 = vpop.permute.xlu1 %170  ;;  %v163_v27 = vpop.permute.xlu0 %162 }
 0x17e   :  { %176 = vst.msk [vmem:[#allocation6] sm:$0xff] %vm40_vm0, %v171_v26  ;;  %168 = vst.msk [vmem:[#allocation4] sm:$0xff] %vm40_vm0, %v163_v27 }
 0x185   :  { %v173_v28 = vpop.permute.xlu1 %172  ;;  %v165_v29 = vpop.permute.xlu0 %164 }
 0x186   :  { %177 = vst.msk [vmem:[#allocation6 + $0x8] sm:$0xff] %vm40_vm0, %v173_v28  ;;  %169 = vst.msk [vmem:[#allocation4 + $0x8] sm:$0xff] %vm40_vm0, %v165_v29 }
 0x187   :  { %357 = shalt.err (!%p354_p12)
}
 0x188   :  { %s358_s17 = scalar_lea.hbm %s570_s4, 256 }
 0x189   :  { %p359_p13 = scmp.ne.s32.totalorder %s570_s4, %s358_s17  ;;  %p362_p0 = scmp.lt.u32.totalorder %s358_s17, %s570_s4 }
 0x18b   :  { %p364_p1 = pnand %p362_p0, %p359_p13 }
 0x18d   :  { %367 = shalt.err (!%p364_p1)
}
 0x18e   :  { %201 = dma.vmem_to_hbm [thread:$0]  %s196_s12, 256, %s570_s4, [#allocation5], %s397_s7, %s397_s7, %s398_s8  }
 0x18f   :  { %s368_s23 = scalar_lea.vmem %s527_s14, 256  ;;  %p373_p3 = scmp.lt.s32.totalorder %s527_s14, %s527_s14 }
 0x190   :  { %p369_p2 = scmp.ne.s32.totalorder %s527_s14, %s368_s23  ;;  %p374_p4 = scmp.lt.s32.totalorder %s368_s23, %s368_s23 }
 0x192   :  { %p375_p5 = por %p374_p4, %p373_p3 }
 0x194   :  { %p376_p6 = pnand %p375_p5, %p369_p2 }
 0x196   :  { %379 = shalt.err (!%p376_p6)
}
 0x197   :  { %s380_s25 = scalar_lea.hbm %s571_s5, 256 }
 0x198   :  { %p381_p7 = scmp.ne.s32.totalorder %s571_s5, %s380_s25  ;;  %p384_p8 = scmp.lt.u32.totalorder %s380_s25, %s571_s5 }
 0x19a   :  { %p386_p9 = pnand %p384_p8, %p381_p7 }
 0x19c   :  { %389 = shalt.err (!%p386_p9)
}
 0x19d   :  { %213 = dma.vmem_to_hbm [thread:$0]  %s527_s14, 256, %s571_s5, [#allocation5], %s397_s7, %s397_s7, %s398_s8  }
 0x19e   :  { %390 = dma.done.wait [#allocation3], 256  }
 0x19f   :  { %391 = vsyncadd [#allocation3], 4294967040 }
 0x1a0   :  { %392 = dma.done.wait [#allocation5], 512  }
 0x1a1   :  { %393 = vsyncadd [#allocation5], 4294966784 }
 0x1a2   :  { %223 = vsyncpa [#allocation3], 1 }
 0x1a3   :  { %224 = vsyncpa [#allocation5], 1 }

</bundles_post_ra>
